<compile_context>
chip_gen: v7x
topology: tpu7x:2x2x1
jax: 0.10.0
libtpu: 0.0.40
codegen_flags: <defaults>
</compile_context>

<pallas_src>
import functools

import jax
import jax.numpy as jnp
import numpy as np
from jax.experimental import pallas as pl
from jax.experimental.pallas import tpu as pltpu


def _adain_kernel(x_ref, w_ref, sw_ref, sb_ref, bw_ref, bb_ref, o_ref, *,
                  ws_scale, eps):
    # x_ref : [Bt, C, HW]   (NCHW with spatial flattened; HW on the lane dim)
    # w_ref : [Bt, Wd]
    # sw_ref/bw_ref : [Wd, C]   (WSLinear weights, pre-transposed)
    # sb_ref/bb_ref : [1, C]    (WSLinear biases)
    # o_ref : [Bt, C, HW]
    x = x_ref[...].astype(jnp.float32)                        # [Bt, C, HW]

    # InstanceNorm2d (affine=False, biased variance); reduce over lanes (HW).
    mean = jnp.mean(x, axis=-1, keepdims=True)                # [Bt, C, 1]
    xc = x - mean
    var = jnp.mean(xc * xc, axis=-1, keepdims=True)           # [Bt, C, 1]
    x_norm = xc * jax.lax.rsqrt(var + eps)                    # [Bt, C, HW]

    # WSLinear heads: linear(w * ws_scale) + bias  (two tiny MXU matmuls).
    w = w_ref[...].astype(jnp.float32) * ws_scale             # [Bt, Wd]
    style_scale = (jnp.dot(w, sw_ref[...].astype(jnp.float32),
                           preferred_element_type=jnp.float32)
                   + sb_ref[...].astype(jnp.float32))         # [Bt, C]
    style_bias = (jnp.dot(w, bw_ref[...].astype(jnp.float32),
                          preferred_element_type=jnp.float32)
                  + bb_ref[...].astype(jnp.float32))          # [Bt, C]

    out = style_scale[:, :, None] * x_norm + style_bias[:, :, None]
    o_ref[...] = out.astype(o_ref.dtype)


def _pick_batch_tile(batch, per_batch_block_bytes,
                     budget_bytes=8 * 1024 * 1024):
    """Largest divisor of `batch` whose double-buffered in+out blocks fit."""
    bt = 1
    for cand in range(1, batch + 1):
        # 2 pipeline buffers x 2 arrays (input block + output block).
        if batch % cand == 0 and 4 * cand * per_batch_block_bytes <= budget_bytes:
            bt = cand
    return bt


def adain(x, w, scale_weight, scale_bias, bias_weight, bias_bias, *, eps=1e-5):
    """AdaIN forward.

    x            : [B, C, H, W]  (NCHW, matching PyTorch)
    w            : [B, w_dim]
    scale_weight : [C, w_dim]   (self.style_scale.linear.weight)
    scale_bias   : [C]          (self.style_scale.bias)
    bias_weight  : [C, w_dim]   (self.style_bias.linear.weight)
    bias_bias    : [C]          (self.style_bias.bias)
    Returns      : [B, C, H, W]
    """
    B, C, H, W = x.shape
    Wd = w.shape[1]
    HW = H * W

    # Native layout: contiguous reshape only (no transpose of the big tensor).
    x_flat = x.reshape(B, C, HW)
    sw_t = jnp.transpose(scale_weight)          # [Wd, C]  (tiny)
    bw_t = jnp.transpose(bias_weight)           # [Wd, C]
    sb = scale_bias.reshape(1, C)
    bb = bias_bias.reshape(1, C)

    per_batch_bytes = C * HW * x.dtype.itemsize
    Bt = _pick_batch_tile(B, per_batch_bytes)

    ws_scale = float((2.0 / Wd) ** 0.5)
    kernel = functools.partial(_adain_kernel, ws_scale=ws_scale, eps=float(eps))

    out = pl.pallas_call(
        kernel,
        out_shape=jax.ShapeDtypeStruct((B, C, HW), x.dtype),
        grid_spec=pltpu.PrefetchScalarGridSpec(
            num_scalar_prefetch=0,
            grid=(B // Bt,),
            in_specs=[
                pl.BlockSpec((Bt, C, HW), lambda b: (b, 0, 0)),   # x
                pl.BlockSpec((Bt, Wd), lambda b: (b, 0)),         # w
                pl.BlockSpec((Wd, C), lambda b: (0, 0)),          # scale weight^T
                pl.BlockSpec((1, C), lambda b: (0, 0)),           # scale bias
                pl.BlockSpec((Wd, C), lambda b: (0, 0)),          # bias weight^T
                pl.BlockSpec((1, C), lambda b: (0, 0)),           # bias bias
            ],
            out_specs=pl.BlockSpec((Bt, C, HW), lambda b: (b, 0, 0)),
        ),
        compiler_params=pltpu.CompilerParams(
            dimension_semantics=("parallel",)),
    )(x_flat, w, sw_t, sb, bw_t, bb)

    return out.reshape(B, C, H, W)


def adain_ref(x, w, scale_weight, scale_bias, bias_weight, bias_bias, eps=1e-5):
    """Pure-JAX reference mirroring the PyTorch module."""
    mean = jnp.mean(x, axis=(2, 3), keepdims=True)
    var = jnp.var(x, axis=(2, 3), keepdims=True)       # biased, matches InstanceNorm2d
    x_n = (x - mean) / jnp.sqrt(var + eps)
    ws = (2.0 / w.shape[1]) ** 0.5
    ss = (w * ws) @ scale_weight.T + scale_bias        # [B, C]
    sb = (w * ws) @ bias_weight.T + bias_bias          # [B, C]
    return ss[:, :, None, None] * x_n + sb[:, :, None, None]


if __name__ == "__main__":
    B, C, H, W = 2, 64, 16, 16
    w_dim = 32

    key = jax.random.PRNGKey(0)
    kx, kw, k1, k2, k3, k4 = jax.random.split(key, 6)

    x = jax.random.normal(kx, (B, C, H, W), dtype=jnp.float32)
    w = jax.random.normal(kw, (B, w_dim), dtype=jnp.float32)
    # WSLinear weights (nn.init.normal_, scaled down for tight tolerances);
    # biases are zero-init in the module but use small nonzero values here to
    # exercise the bias path.
    scale_weight = jax.random.normal(k1, (C, w_dim), dtype=jnp.float32) * 0.1
    bias_weight = jax.random.normal(k2, (C, w_dim), dtype=jnp.float32) * 0.1
    scale_bias = jax.random.normal(k3, (C,), dtype=jnp.float32) * 0.1
    bias_bias = jax.random.normal(k4, (C,), dtype=jnp.float32) * 0.1

    out = adain(x, w, scale_weight, scale_bias, bias_weight, bias_bias)
    out = jax.block_until_ready(out)

    ref = adain_ref(x, w, scale_weight, scale_bias, bias_weight, bias_bias)
    np.testing.assert_allclose(np.asarray(out), np.asarray(ref),
                               rtol=1e-5, atol=1e-4)

    print("KERNEL_OK")
</pallas_src>

<mosaic_0001>
module attributes {stable_mosaic.version = 11 : i64} {
  func.func @_adain_kernel(%arg0: i32, %arg1: memref<2x64x256xf32, #tpu.memory_space<vmem>>, %arg2: memref<2x32xf32, #tpu.memory_space<vmem>>, %arg3: memref<32x64xf32, #tpu.memory_space<vmem>>, %arg4: memref<1x64xf32, #tpu.memory_space<vmem>>, %arg5: memref<32x64xf32, #tpu.memory_space<vmem>>, %arg6: memref<1x64xf32, #tpu.memory_space<vmem>>, %arg7: memref<2x64x256xf32, #tpu.memory_space<vmem>>) attributes {dimension_semantics = [#tpu.dimension_semantics<parallel>], iteration_bounds = array<i64: 1>, scalar_prefetch = 0 : i64, scratch_operands = 0 : i64, tpu.core_type = #tpu.core_type<tc>, window_params = [{transform_indices = @transform_0, window_bounds = array<i64: 2, 64, 256>}, {transform_indices = @transform_1, window_bounds = array<i64: 2, 32>}, {pipeline_mode = #tpu.pipeline_mode<synchronous>, transform_indices = @transform_2, window_bounds = array<i64: 32, 64>}, {pipeline_mode = #tpu.pipeline_mode<synchronous>, transform_indices = @transform_3, window_bounds = array<i64: 1, 64>}, {pipeline_mode = #tpu.pipeline_mode<synchronous>, transform_indices = @transform_4, window_bounds = array<i64: 32, 64>}, {pipeline_mode = #tpu.pipeline_mode<synchronous>, transform_indices = @transform_5, window_bounds = array<i64: 1, 64>}, {transform_indices = @transform_6, window_bounds = array<i64: 2, 64, 256>}]} {
    %c0 = arith.constant 0 : index
    %c0_0 = arith.constant 0 : index
    %c0_1 = arith.constant 0 : index
    %0 = vector.load %arg1[%c0, %c0_0, %c0_1] : memref<2x64x256xf32, #tpu.memory_space<vmem>>, vector<2x64x256xf32>
    %cst = arith.constant dense<0.000000e+00> : vector<2x64xf32>
    %1 = vector.multi_reduction <add>, %0, %cst [2] : vector<2x64x256xf32> to vector<2x64xf32>
    %2 = vector.shape_cast %1 : vector<2x64xf32> to vector<2x64x1xf32>
    %cst_2 = arith.constant 2.560000e+02 : f32
    %3 = vector.broadcast %cst_2 : f32 to vector<2x64x1xf32>
    %4 = arith.divf %2, %3 : vector<2x64x1xf32>
    %5 = vector.broadcast %4 : vector<2x64x1xf32> to vector<2x64x256xf32>
    %6 = arith.subf %0, %5 : vector<2x64x256xf32>
    %7 = arith.mulf %6, %6 : vector<2x64x256xf32>
    %cst_3 = arith.constant dense<0.000000e+00> : vector<2x64xf32>
    %8 = vector.multi_reduction <add>, %7, %cst_3 [2] : vector<2x64x256xf32> to vector<2x64xf32>
    %9 = vector.shape_cast %8 : vector<2x64xf32> to vector<2x64x1xf32>
    %cst_4 = arith.constant 2.560000e+02 : f32
    %10 = vector.broadcast %cst_4 : f32 to vector<2x64x1xf32>
    %11 = arith.divf %9, %10 : vector<2x64x1xf32>
    %cst_5 = arith.constant 9.99999974E-6 : f32
    %12 = vector.broadcast %cst_5 : f32 to vector<2x64x1xf32>
    %13 = arith.addf %11, %12 : vector<2x64x1xf32>
    %14 = math.rsqrt %13 : vector<2x64x1xf32>
    %15 = vector.broadcast %14 : vector<2x64x1xf32> to vector<2x64x256xf32>
    %16 = arith.mulf %6, %15 : vector<2x64x256xf32>
    %c0_6 = arith.constant 0 : index
    %c0_7 = arith.constant 0 : index
    %17 = vector.load %arg2[%c0_6, %c0_7] : memref<2x32xf32, #tpu.memory_space<vmem>>, vector<2x32xf32>
    %cst_8 = arith.constant 2.500000e-01 : f32
    %18 = vector.broadcast %cst_8 : f32 to vector<2x32xf32>
    %19 = arith.mulf %17, %18 : vector<2x32xf32>
    %c0_9 = arith.constant 0 : index
    %c0_10 = arith.constant 0 : index
    %20 = vector.load %arg3[%c0_9, %c0_10] : memref<32x64xf32, #tpu.memory_space<vmem>>, vector<32x64xf32>
    %cst_11 = arith.constant dense<0.000000e+00> : vector<2x64xf32>
    %21 = tpu.matmul %19, %20, %cst_11 {dimension_numbers = #tpu.dot_dimension_numbers<[1], [0], [0], [1], [0, 0, 1, 1], [], []>} : vector<2x32xf32>, vector<32x64xf32>, vector<2x64xf32> -> vector<2x64xf32>
    %c0_12 = arith.constant 0 : index
    %c0_13 = arith.constant 0 : index
    %22 = vector.load %arg4[%c0_12, %c0_13] : memref<1x64xf32, #tpu.memory_space<vmem>>, vector<1x64xf32>
    %23 = vector.broadcast %22 : vector<1x64xf32> to vector<2x64xf32>
    %24 = arith.addf %21, %23 : vector<2x64xf32>
    %c0_14 = arith.constant 0 : index
    %c0_15 = arith.constant 0 : index
    %25 = vector.load %arg5[%c0_14, %c0_15] : memref<32x64xf32, #tpu.memory_space<vmem>>, vector<32x64xf32>
    %cst_16 = arith.constant dense<0.000000e+00> : vector<2x64xf32>
    %26 = tpu.matmul %19, %25, %cst_16 {dimension_numbers = #tpu.dot_dimension_numbers<[1], [0], [0], [1], [0, 0, 1, 1], [], []>} : vector<2x32xf32>, vector<32x64xf32>, vector<2x64xf32> -> vector<2x64xf32>
    %c0_17 = arith.constant 0 : index
    %c0_18 = arith.constant 0 : index
    %27 = vector.load %arg6[%c0_17, %c0_18] : memref<1x64xf32, #tpu.memory_space<vmem>>, vector<1x64xf32>
    %28 = vector.broadcast %27 : vector<1x64xf32> to vector<2x64xf32>
    %29 = arith.addf %26, %28 : vector<2x64xf32>
    %30 = vector.shape_cast %24 : vector<2x64xf32> to vector<2x64x1xf32>
    %31 = vector.broadcast %30 : vector<2x64x1xf32> to vector<2x64x256xf32>
    %32 = arith.mulf %31, %16 : vector<2x64x256xf32>
    %33 = vector.shape_cast %29 : vector<2x64xf32> to vector<2x64x1xf32>
    %34 = vector.broadcast %33 : vector<2x64x1xf32> to vector<2x64x256xf32>
    %35 = arith.addf %32, %34 : vector<2x64x256xf32>
    %c0_19 = arith.constant 0 : index
    %c0_20 = arith.constant 0 : index
    %c0_21 = arith.constant 0 : index
    %36 = vector.load %arg7[%c0_19, %c0_20, %c0_21] : memref<2x64x256xf32, #tpu.memory_space<vmem>>, vector<2x64x256xf32>
    tpu.vector_store %arg7[%c0_19, %c0_20, %c0_21], %35 {strides = array<i32>} : memref<2x64x256xf32, #tpu.memory_space<vmem>>, vector<2x64x256xf32>,
    return
  }
  func.func @transform_0(%arg0: i32) -> (i32, i32, i32) {
    %c0_i32 = arith.constant 0 : i32
    %c0_i32_0 = arith.constant 0 : i32
    %c0_i32_1 = arith.constant 0 : i32
    return %arg0, %c0_i32, %c0_i32_0 : i32, i32, i32
  }
  func.func @transform_1(%arg0: i32) -> (i32, i32) {
    %c0_i32 = arith.constant 0 : i32
    %c0_i32_0 = arith.constant 0 : i32
    return %arg0, %c0_i32 : i32, i32
  }
  func.func @transform_2(%arg0: i32) -> (i32, i32) {
    %c0_i32 = arith.constant 0 : i32
    %c0_i32_0 = arith.constant 0 : i32
    %c0_i32_1 = arith.constant 0 : i32
    return %c0_i32, %c0_i32_0 : i32, i32
  }
  func.func @transform_3(%arg0: i32) -> (i32, i32) {
    %c0_i32 = arith.constant 0 : i32
    %c0_i32_0 = arith.constant 0 : i32
    %c0_i32_1 = arith.constant 0 : i32
    return %c0_i32, %c0_i32_0 : i32, i32
  }
  func.func @transform_4(%arg0: i32) -> (i32, i32) {
    %c0_i32 = arith.constant 0 : i32
    %c0_i32_0 = arith.constant 0 : i32
    %c0_i32_1 = arith.constant 0 : i32
    return %c0_i32, %c0_i32_0 : i32, i32
  }
  func.func @transform_5(%arg0: i32) -> (i32, i32) {
    %c0_i32 = arith.constant 0 : i32
    %c0_i32_0 = arith.constant 0 : i32
    %c0_i32_1 = arith.constant 0 : i32
    return %c0_i32, %c0_i32_0 : i32, i32
  }
  func.func @transform_6(%arg0: i32) -> (i32, i32, i32) {
    %c0_i32 = arith.constant 0 : i32
    %c0_i32_0 = arith.constant 0 : i32
    %c0_i32_1 = arith.constant 0 : i32
    return %arg0, %c0_i32, %c0_i32_0 : i32, i32, i32
  }
}

</mosaic_0001>

<bundles_post_ra>
// kernel: tpu_custom_call.1
= control target key start
LH: loop header
LB: loop body
LE: loop exit
PB: predicated region body
PF: predicated region fallthrough
CT: control target
= control target key end

     0   :  { %11 = vsyncpa [#allocation3], 0  ;;  %s1435_s0 = inlined_call_operand.hbm [shape: f32[2,64,256], index: 0, kind: input, shape index: {}]   ;;  %s1436_s1 = inlined_call_operand.vmem [shape: f32[2,32], index: 1, kind: input, shape index: {}]   ;;  %s1437_s2 = inlined_call_operand.hbm [shape: f32[32,64], index: 2, kind: input, shape index: {}]   ;;  %s1438_s3 = inlined_call_operand.vmem [shape: f32[1,64], index: 3, kind: input, shape index: {}]   ;;  %s1439_s4 = inlined_call_operand.hbm [shape: f32[32,64], index: 4, kind: input, shape index: {}]   ;;  %s1440_s5 = inlined_call_operand.vmem [shape: f32[1,64], index: 5, kind: input, shape index: {}]   ;;  %s1441_s6 = inlined_call_operand.hbm [shape: f32[2,64,256], index: 6, kind: output, shape index: {}]  }
   0x1   :  { %12 = vsyncpa [#allocation6], 0 }
   0x2   :  { %13 = vsyncpa [#allocation4], 0  ;;  %s961_s21 = smov [#allocation5]   ;;  %s867_s25 = scalar_lea.hbm %s1437_s2, 512 }
   0x3   :  { %s33_s22 = sshll.u32 %s961_s21, 4  ;;  %p868_p0 = scmp.ne.s32.totalorder %s1437_s2, %s867_s25  ;;  %s34_s22 = int_to_ptr.vmem [resolvable:$true] %s33_s22 }
   0x4   :  { %p871_p1 = scmp.lt.u32.totalorder %s867_s25, %s1437_s2 }
   0x6   :  { %p873_p2 = pnand %p871_p1, %p868_p0 }
   0x8   :  { %876 = shalt.err (!%p873_p2)
}
   0x9   :  { %s877_s30 = scalar_lea.vmem %s34_s22, 512  ;;  %p882_p4 = scmp.lt.s32.totalorder %s34_s22, %s34_s22 }
   0xa   :  { %p878_p3 = scmp.ne.s32.totalorder %s34_s22, %s877_s30  ;;  %p883_p5 = scmp.lt.s32.totalorder %s877_s30, %s877_s30 }
   0xc   :  { %p884_p6 = por %p883_p5, %p882_p4 }
   0xe   :  { %p885_p7 = pnand %p884_p6, %p878_p3 }
  0x10   :  { %888 = shalt.err (!%p885_p7)
}
  0x11   :  { %s962_s7 = smov 128   ;;  %s963_s8 = smov 8  }
  0x12   :  { %39 = dma.hbm_to_vmem [thread:$0]  %s1437_s2, 512, %s34_s22, [#allocation6], %s962_s7, %s962_s7, %s963_s8  }
  0x13   :  { %s964_s11 = smov [#allocation2]   ;;  %s889_s15 = scalar_lea.hbm %s1435_s0, 4096 }
  0x14   :  { %s19_s12 = sshll.u32 %s964_s11, 4  ;;  %p890_p8 = scmp.ne.s32.totalorder %s1435_s0, %s889_s15  ;;  %s20_s12 = int_to_ptr.vmem [resolvable:$true] %s19_s12 }
  0x15   :  { %p893_p9 = scmp.lt.u32.totalorder %s889_s15, %s1435_s0 }
  0x17   :  { %p895_p10 = pnand %p893_p9, %p890_p8 }
  0x19   :  { %898 = shalt.err (!%p895_p10)
}
  0x1a   :  { %s899_s20 = scalar_lea.vmem %s20_s12, 4096  ;;  %p904_p12 = scmp.lt.s32.totalorder %s20_s12, %s20_s12 }
  0x1b   :  { %p900_p11 = scmp.ne.s32.totalorder %s20_s12, %s899_s20  ;;  %p905_p13 = scmp.lt.s32.totalorder %s899_s20, %s899_s20 }
  0x1d   :  { %p906_p0 = por %p905_p13, %p904_p12 }
  0x1f   :  { %p907_p1 = pnand %p906_p0, %p900_p11 }
  0x21   :  { %910 = shalt.err (!%p907_p1)
}
  0x22   :  { %s965_s2 = smov 256   ;;  %s966_s21 = smov 16  }
  0x23   :  { %25 = dma.hbm_to_vmem [thread:$0]  %s1435_s0, 4096, %s20_s12, [#allocation3], %s965_s2, %s965_s2, %s966_s21  }
  0x24   :  { %s967_s24 = smov [#allocation7]   ;;  %s911_s28 = scalar_lea.hbm %s1439_s4, 512 }
  0x25   :  { %s47_s25 = sshll.u32 %s967_s24, 4  ;;  %p912_p2 = scmp.ne.s32.totalorder %s1439_s4, %s911_s28  ;;  %s48_s25 = int_to_ptr.vmem [resolvable:$true] %s47_s25 }
  0x26   :  { %p915_p3 = scmp.lt.u32.totalorder %s911_s28, %s1439_s4 }
  0x28   :  { %p917_p4 = pnand %p915_p3, %p912_p2 }
  0x2a   :  { %920 = shalt.err (!%p917_p4)
}
  0x2b   :  { %s921_s11 = scalar_lea.vmem %s48_s25, 512  ;;  %p926_p6 = scmp.lt.s32.totalorder %s48_s25, %s48_s25 }
  0x2c   :  { %p922_p5 = scmp.ne.s32.totalorder %s48_s25, %s921_s11  ;;  %p927_p7 = scmp.lt.s32.totalorder %s921_s11, %s921_s11 }
  0x2e   :  { %p928_p8 = por %p927_p7, %p926_p6 }
  0x30   :  { %p929_p9 = pnand %p928_p8, %p922_p5 }
  0x32   :  { %932 = shalt.err (!%p929_p9)
}
  0x33   :  { %53 = dma.hbm_to_vmem [thread:$0]  %s1439_s4, 512, %s48_s25, [#allocation6], %s962_s7, %s962_s7, %s963_s8  }
  0x34   :  { %955 = dma.done.wait [#allocation3], 4096  }
  0x35   :  { %956 = vsyncadd [#allocation3], 4294963200 }
  0x36   :  { %957 = dma.done.wait [#allocation6], 1024  }
  0x37   :  { %958 = vsyncadd [#allocation6], 4294966272  ;;  %v968_v0 = vmov 0.0|0.0   ;;  %vm969_vm0 = vmmov 0   ;;  %v970_v1 = vmov 0.0   ;;  %v356_v2 = vld [vmem:[#allocation5] sm:$0xff] }
  0x38   :  { %812 = vmatprep.subr.bf16.mxu0 %v968_v0  ;;  %798 = vmatprep.mubr.msk.f32.mxu0 %vm969_vm0, %v970_v1  ;;  %v357_v3 = vld [vmem:[#allocation5 + $0x8] sm:$0xff]  ;;  %v1052_v4 = vld [vmem:[#allocation2] sm:$0xff]  ;;  %v358_v7 = vld [vmem:[#allocation5 + $0x10] sm:$0xff]  ;;  %vm367_vm1 = vcmask 261120  }
  0x39   :  { %818 = vmatprep.subr.bf16.mxu1 %v968_v0  ;;  %809 = vmatprep.mubr.msk.f32.mxu1 %vm969_vm0, %v970_v1  ;;  %v813_v5 = vpack.c.bf16 %v357_v3, %v356_v2  ;;  %v1054_v6 = vld [vmem:[#allocation2 + $0x8] sm:$0xff]  ;;  %v359_v8 = vld [vmem:[#allocation5 + $0x18] sm:$0xff]  ;;  %v1058_v10 = vld [vmem:[#allocation2 + $0x20] sm:$0xff] }
  0x3a   :  { %v97_v9 = vadd.f32 %v1054_v6, %v1052_v4  ;;  %v1060_v11 = vld [vmem:[#allocation2 + $0x28] sm:$0xff]  ;;  %v1062_v12 = vld [vmem:[#allocation2 + $0x10] sm:$0xff]  ;;  %v816_v13 = vpack.c.bf16 %v359_v8, %v358_v7  ;;  %v1066_v15 = vld [vmem:[#allocation2 + $0x18] sm:$0xff] }
  0x3b   :  { %814 = vmatpush3.bf16.msra.mxu0 %v813_v5  ;;  %v103_v14 = vadd.f32 %v1060_v11, %v1058_v10  ;;  %v354_v16 = vld [vmem:[%s1436_s1] sm:$0x3]  ;;  %v1071_v17 = vld [vmem:[#allocation2 + $0x30] sm:$0xff]  ;;  %v100_v18 = vadd.f32 %v1066_v15, %v1062_v12  ;;  %v1075_v19 = vld [vmem:[#allocation2 + $0x38] sm:$0xff] }
  0x3c   :  { %98 = vadd.xlane.f32.xlu0 %v97_v9  ;;  %815 = vmatprep.subr.bf16.mxu0 %v968_v0  ;;  %v106_v20 = vadd.f32 %v1075_v19, %v1071_v17  ;;  %v1079_v21 = vld [vmem:[#allocation2 + $0x40] sm:$0xff]  ;;  %v1081_v22 = vld [vmem:[#allocation2 + $0x48] sm:$0xff]  ;;  %v355_v23 = vmul.f32 0.25, %v354_v16  ;;  %v1083_v24 = vld [vmem:[#allocation2 + $0x50] sm:$0xff] }
  0x3d   :  { %104 = vadd.xlane.f32.xlu1 %v103_v14  ;;  %v1085_v25 = vld [vmem:[#allocation2 + $0x58] sm:$0xff]  ;;  %v109_v26 = vadd.f32 %v1081_v22, %v1079_v21  ;;  %v1091_v28 = vld [vmem:[#allocation2 + $0x60] sm:$0xff]  ;;  %v1093_v29 = vld [vmem:[#allocation2 + $0x68] sm:$0xff] }
  0x3e   :  { %v112_v27 = vadd.f32 %v1085_v25, %v1083_v24  ;;  %v1095_v30 = vld [vmem:[#allocation2 + $0x70] sm:$0xff]  ;;  %v1098_v31 = vld [vmem:[#allocation2 + $0x78] sm:$0xff]  ;;  %v441_v32 = vld [vmem:[#allocation7] sm:$0xff]  ;;  %v115_v35 = vadd.f32 %v1093_v29, %v1091_v28 }
  0x3f   :  { %817 = vmatpush3.bf16.msra.mxu0 %v816_v13  ;;  %v442_v33 = vld [vmem:[#allocation7 + $0x8] sm:$0xff]  ;;  %v443_v36 = vld [vmem:[#allocation7 + $0x10] sm:$0xff]  ;;  %v444_v37 = vld [vmem:[#allocation7 + $0x18] sm:$0xff]  ;;  %v118_v38 = vadd.f32 %v1098_v31, %v1095_v30 }
  0x40   :  { %101 = vadd.xlane.f32.xlu0 %v100_v18  ;;  %v819_v34 = vpack.c.bf16 %v442_v33, %v441_v32  ;;  %v1104_v39 = vld [vmem:[#allocation2 + $0x80] sm:$0xff]  ;;  %v1106_v40 = vld [vmem:[#allocation2 + $0x88] sm:$0xff]  ;;  %v822_v41 = vpack.c.bf16 %v444_v37, %v443_v36  ;;  %v1108_v42 = vld [vmem:[#allocation2 + $0x90] sm:$0xff] }
  0x41   :  { %107 = vadd.xlane.f32.xlu1 %v106_v20  ;;  %v1110_v43 = vld [vmem:[#allocation2 + $0x98] sm:$0xff]  ;;  %v121_v44 = vadd.f32 %v1106_v40, %v1104_v39  ;;  %v1116_v46 = vld [vmem:[#allocation2 + $0xa0] sm:$0xff]  ;;  %v1118_v47 = vld [vmem:[#allocation2 + $0xa8] sm:$0xff] }
  0x42   :  { %799 = vmatmul.mubr.msk.f32.vlgmr.msra.gmra.mrb[0].mxu0 %vm367_vm1, %v355_v23  ;;  %820 = vmatpush3.bf16.msra.mxu1 %v819_v34  ;;  %v124_v45 = vadd.f32 %v1110_v43, %v1108_v42  ;;  %v1120_v48 = vld [vmem:[#allocation2 + $0xb0] sm:$0xff]  ;;  %v1122_v49 = vld [vmem:[#allocation2 + $0xb8] sm:$0xff]  ;;  %v127_v50 = vadd.f32 %v1118_v47, %v1116_v46  ;;  %v1129_v52 = vld [vmem:[#allocation2 + $0xc0] sm:$0xff] }
  0x43   :  { %821 = vmatprep.subr.bf16.mxu1 %v968_v0  ;;  %v130_v51 = vadd.f32 %v1122_v49, %v1120_v48  ;;  %v1131_v53 = vld [vmem:[#allocation2 + $0xc8] sm:$0xff]  ;;  %v1133_v54 = vld [vmem:[#allocation2 + $0xd0] sm:$0xff]  ;;  %v1135_v55 = vld [vmem:[#allocation2 + $0xd8] sm:$0xff] }
  0x44   :  { %110 = vadd.xlane.f32.xlu0 %v109_v26  ;;  %v133_v56 = vadd.f32 %v1131_v53, %v1129_v52  ;;  %v136_v57 = vadd.f32 %v1135_v55, %v1133_v54  ;;  %v1141_v58 = vld [vmem:[#allocation2 + $0xe0] sm:$0xff]  ;;  %v1143_v59 = vld [vmem:[#allocation2 + $0xe8] sm:$0xff]  ;;  %v1145_v60 = vld [vmem:[#allocation2 + $0xf0] sm:$0xff] }
  0x45   :  { %113 = vadd.xlane.f32.xlu1 %v112_v27  ;;  %v1147_v61 = vld [vmem:[#allocation2 + $0xf8] sm:$0xff]  ;;  %v139_v62 = vadd.f32 %v1143_v59, %v1141_v58 }
  0x46   :  { %823 = vmatpush3.bf16.msra.mxu1 %v822_v41  ;;  %v142_v63 = vadd.f32 %v1147_v61, %v1145_v60 }
  0x48   :  { %116 = vadd.xlane.f32.xlu0 %v115_v35 }
  0x49   :  { %119 = vadd.xlane.f32.xlu1 %v118_v38  ;;  %810 = vmatmul.mubr.msk.f32.vlgmr.msra.gmra.mrb[0].mxu1 %vm367_vm1, %v355_v23 }
  0x4c   :  { %122 = vadd.xlane.f32.xlu0 %v121_v44 }
  0x4d   :  { %125 = vadd.xlane.f32.xlu1 %v124_v45 }
  0x50   :  { %128 = vadd.xlane.f32.xlu0 %v127_v50 }
  0x51   :  { %131 = vadd.xlane.f32.xlu1 %v130_v51 }
  0x54   :  { %134 = vadd.xlane.f32.xlu0 %v133_v56 }
  0x55   :  { %137 = vadd.xlane.f32.xlu1 %v136_v57 }
  0x58   :  { %140 = vadd.xlane.f32.xlu0 %v139_v62 }
  0x59   :  { %143 = vadd.xlane.f32.xlu1 %v142_v63 }
  0xc9   :  { %v99_v0 = vpop.xlane.xlu0 %98 }
  0xca   :  { %v146_v1 = vmul.f32 0.00390625, %v99_v0  ;;  %v105_v2 = vpop.xlane.xlu1 %104 }
  0xcb   :  { %v148_v3 = vmul.f32 0.00390625, %v105_v2 }
  0xcc   :  { %v1154_v5 = vsub.f32 %v1052_v4, %v146_v1  ;;  %v1157_v7 = vsub.f32 %v1054_v6, %v146_v1 }
  0xcd   :  { %v1160_v8 = vsub.f32 %v1058_v10, %v148_v3  ;;  %v1163_v9 = vsub.f32 %v1060_v11, %v148_v3  ;;  %v102_v13 = vpop.xlane.xlu0 %101 }
  0xce   :  { %v147_v14 = vmul.f32 0.00390625, %v102_v13  ;;  %v108_v16 = vpop.xlane.xlu1 %107  ;;  %v194_v18 = vmul.f32 %v1154_v5, %v1154_v5  ;;  %v195_v20 = vmul.f32 %v1157_v7, %v1157_v7 }
  0xcf   :  { %v149_v4 = vmul.f32 0.00390625, %v108_v16  ;;  %v198_v6 = vmul.f32 %v1160_v8, %v1160_v8  ;;  %v199_v10 = vmul.f32 %v1163_v9, %v1163_v9 }
  0xd0   :  { %v1174_v23 = vsub.f32 %v1062_v12, %v147_v14  ;;  %v1177_v11 = vsub.f32 %v1066_v15, %v147_v14  ;;  %v226_v26 = vadd.f32 %v195_v20, %v194_v18 }
  0xd1   :  { %v1180_v27 = vsub.f32 %v1071_v17, %v149_v4  ;;  %v1183_v32 = vsub.f32 %v1075_v19, %v149_v4  ;;  %v111_v33 = vpop.xlane.xlu0 %110  ;;  %v232_v36 = vadd.f32 %v199_v10, %v198_v6 }
  0xd2   :  { %v150_v34 = vmul.f32 0.00390625, %v111_v33  ;;  %227 = vadd.xlane.f32.xlu0 %v226_v26  ;;  %v114_v35 = vpop.xlane.xlu1 %113  ;;  %v196_v37 = vmul.f32 %v1174_v23, %v1174_v23  ;;  %v197_v12 = vmul.f32 %v1177_v11, %v1177_v11 }
  0xd3   :  { %v151_v15 = vmul.f32 0.00390625, %v114_v35  ;;  %v200_v38 = vmul.f32 %v1180_v27, %v1180_v27  ;;  %v201_v17 = vmul.f32 %v1183_v32, %v1183_v32 }
  0xd4   :  { %v1194_v19 = vsub.f32 %v1079_v21, %v150_v34  ;;  %v1197_v41 = vsub.f32 %v1081_v22, %v150_v34  ;;  %v229_v44 = vadd.f32 %v197_v12, %v196_v37 }
  0xd5   :  { %v1200_v45 = vsub.f32 %v1083_v24, %v151_v15  ;;  %v1203_v50 = vsub.f32 %v1085_v25, %v151_v15  ;;  %v117_v51 = vpop.xlane.xlu0 %116  ;;  %v235_v62 = vadd.f32 %v201_v17, %v200_v38 }
  0xd6   :  { %v152_v56 = vmul.f32 0.00390625, %v117_v51  ;;  %233 = vadd.xlane.f32.xlu0 %v232_v36  ;;  %230 = vadd.xlane.f32.xlu1 %v229_v44  ;;  %v120_v57 = vpop.xlane.xlu1 %119  ;;  %v202_v21 = vmul.f32 %v1194_v19, %v1194_v19  ;;  %v203_v22 = vmul.f32 %v1197_v41, %v1197_v41 }
  0xd7   :  { %v153_v63 = vmul.f32 0.00390625, %v120_v57  ;;  %v204_v24 = vmul.f32 %v1200_v45, %v1200_v45  ;;  %v205_v25 = vmul.f32 %v1203_v50, %v1203_v50 }
  0xd8   :  { %v1214_v0 = vsub.f32 %v1091_v28, %v152_v56  ;;  %v1217_v1 = vsub.f32 %v1093_v29, %v152_v56  ;;  %v238_v2 = vadd.f32 %v203_v22, %v202_v21 }
  0xd9   :  { %v1220_v3 = vsub.f32 %v1095_v30, %v153_v63  ;;  %v1223_v13 = vsub.f32 %v1098_v31, %v153_v63  ;;  %v123_v14 = vpop.xlane.xlu0 %122  ;;  %v241_v20 = vadd.f32 %v205_v25, %v204_v24 }
  0xda   :  { %v154_v16 = vmul.f32 0.00390625, %v123_v14  ;;  %236 = vadd.xlane.f32.xlu1 %v235_v62  ;;  %239 = vadd.xlane.f32.xlu0 %v238_v2  ;;  %v126_v18 = vpop.xlane.xlu1 %125  ;;  %v206_v28 = vmul.f32 %v1214_v0, %v1214_v0  ;;  %v207_v29 = vmul.f32 %v1217_v1, %v1217_v1 }
  0xdb   :  { %v155_v4 = vmul.f32 0.00390625, %v126_v18  ;;  %v208_v30 = vmul.f32 %v1220_v3, %v1220_v3  ;;  %v209_v31 = vmul.f32 %v1223_v13, %v1223_v13 }
  0xdc   :  { %v1234_v6 = vsub.f32 %v1104_v39, %v154_v16  ;;  %v1237_v10 = vsub.f32 %v1106_v40, %v154_v16  ;;  %v244_v26 = vadd.f32 %v207_v29, %v206_v28 }
  0xdd   :  { %v1240_v33 = vsub.f32 %v1108_v42, %v155_v4  ;;  %v1243_v34 = vsub.f32 %v1110_v43, %v155_v4  ;;  %v129_v35 = vpop.xlane.xlu0 %128  ;;  %v247_v12 = vadd.f32 %v209_v31, %v208_v30 }
  0xde   :  { %v156_v36 = vmul.f32 0.00390625, %v129_v35  ;;  %242 = vadd.xlane.f32.xlu1 %v241_v20  ;;  %245 = vadd.xlane.f32.xlu0 %v244_v26  ;;  %v132_v37 = vpop.xlane.xlu1 %131  ;;  %v210_v39 = vmul.f32 %v1234_v6, %v1234_v6  ;;  %v211_v40 = vmul.f32 %v1237_v10, %v1237_v10 }
  0xdf   :  { %v157_v15 = vmul.f32 0.00390625, %v132_v37  ;;  %v212_v42 = vmul.f32 %v1240_v33, %v1240_v33  ;;  %v213_v43 = vmul.f32 %v1243_v34, %v1243_v34 }
  0xe0   :  { %v1254_v38 = vsub.f32 %v1116_v46, %v156_v36  ;;  %v1257_v17 = vsub.f32 %v1118_v47, %v156_v36  ;;  %v250_v44 = vadd.f32 %v211_v40, %v210_v39  ;;  %v522_v40 = vlaneseq }
  0xe1   :  { %v1260_v51 = vsub.f32 %v1120_v48, %v157_v15  ;;  %v1263_v56 = vsub.f32 %v1122_v49, %v157_v15  ;;  %v135_v57 = vpop.xlane.xlu0 %134  ;;  %v253_v22 = vadd.f32 %v213_v43, %v212_v42  ;;  %v776_v42 = vld [vmem:[%s1438_s3] ss:$0 sm:$0xff] }
  0xe2   :  { %v158_v62 = vmul.f32 0.00390625, %v135_v57  ;;  %248 = vadd.xlane.f32.xlu1 %v247_v12  ;;  %251 = vadd.xlane.f32.xlu0 %v250_v44  ;;  %v138_v21 = vpop.xlane.xlu1 %137  ;;  %v214_v46 = vmul.f32 %v1254_v38, %v1254_v38  ;;  %v215_v47 = vmul.f32 %v1257_v17, %v1257_v17  ;;  %v523_v15 = vshrl.u32 %v522_v40, 7 }
  0xe3   :  { %v159_v63 = vmul.f32 0.00390625, %v138_v21  ;;  %v216_v48 = vmul.f32 %v1260_v51, %v1260_v51  ;;  %v217_v49 = vmul.f32 %v1263_v56, %v1263_v56 }
  0xe4   :  { %v1274_v24 = vsub.f32 %v1129_v52, %v158_v62  ;;  %v1277_v25 = vsub.f32 %v1131_v53, %v158_v62  ;;  %v256_v2 = vadd.f32 %v215_v47, %v214_v46  ;;  %v524_v43 = vsub.s32 0, %v523_v15 }
  0xe5   :  { %v1280_v14 = vsub.f32 %v1133_v54, %v159_v63  ;;  %v1283_v16 = vsub.f32 %v1135_v55, %v159_v63  ;;  %v141_v18 = vpop.xlane.xlu0 %140  ;;  %v259_v29 = vadd.f32 %v217_v49, %v216_v48  ;;  %v559_v46 = vsub.s32 1, %v523_v15  ;;  %v778_v48 = vld [vmem:[%s1440_s5] ss:$0 sm:$0xff]  ;;  %s971_s5 = smov [#allocation8]  }
  0xe6   :  { %v160_v20 = vmul.f32 0.00390625, %v141_v18  ;;  %254 = vadd.xlane.f32.xlu1 %v253_v22  ;;  %257 = vadd.xlane.f32.xlu0 %v256_v2  ;;  %v144_v28 = vpop.xlane.xlu1 %143  ;;  %v218_v52 = vmul.f32 %v1274_v24, %v1274_v24  ;;  %v219_v53 = vmul.f32 %v1277_v25, %v1277_v25  ;;  %s763_s14 = sshll.u32 %s971_s5, 4  ;;  %s764_s14 = int_to_ptr.vmem [resolvable:$true] %s763_s14 }
  0xe7   :  { %1449 = vst [vmem:[#allocation12_spill] sm:$0xff] %v1280_v14  ;;  %1450 = vst [vmem:[#allocation13_spill] sm:$0xff] %v1283_v16  ;;  %v161_v4 = vmul.f32 0.00390625, %v144_v28  ;;  %v220_v54 = vmul.f32 %v1280_v14, %v1280_v14  ;;  %v221_v55 = vmul.f32 %v1283_v16, %v1283_v16  ;;  %s933_s15 = scalar_lea.vmem %s764_s14, 4096  ;;  %p938_p11 = scmp.lt.s32.totalorder %s764_s14, %s764_s14 }
  0xe8   :  { %v1294_v30 = vsub.f32 %v1141_v58, %v160_v20  ;;  %v1297_v31 = vsub.f32 %v1143_v59, %v160_v20  ;;  %v262_v26 = vadd.f32 %v219_v53, %v218_v52  ;;  %p934_p10 = scmp.ne.s32.totalorder %s764_s14, %s933_s15  ;;  %p939_p12 = scmp.lt.s32.totalorder %s933_s15, %s933_s15 }
  0xe9   :  { %v1300_v35 = vsub.f32 %v1145_v60, %v161_v4  ;;  %v1303_v36 = vsub.f32 %v1147_v61, %v161_v4  ;;  %v265_v37 = vadd.f32 %v221_v55, %v220_v54 }
  0xea   :  { %1451 = vst [vmem:[#allocation14_spill] sm:$0xff] %v1294_v30  ;;  %1452 = vst [vmem:[#allocation15_spill] sm:$0xff] %v1297_v31  ;;  %260 = vadd.xlane.f32.xlu1 %v259_v29  ;;  %263 = vadd.xlane.f32.xlu0 %v262_v26  ;;  %v222_v12 = vmul.f32 %v1294_v30, %v1294_v30  ;;  %v223_v58 = vmul.f32 %v1297_v31, %v1297_v31  ;;  %p940_p13 = por %p939_p12, %p938_p11 }
  0xeb   :  { %1453 = vst [vmem:[#allocation16_spill] sm:$0xff] %v1300_v35  ;;  %1454 = vst [vmem:[#allocation17_spill] sm:$0xff] %v1303_v36  ;;  %v224_v59 = vmul.f32 %v1300_v35, %v1300_v35  ;;  %v225_v39 = vmul.f32 %v1303_v36, %v1303_v36 }
  0xec   :  { %v268_v60 = vadd.f32 %v223_v58, %v222_v12  ;;  %p941_p0 = pnand %p940_p13, %p934_p10 }
  0xed   :  { %v271_v61 = vadd.f32 %v225_v39, %v224_v59 }
  0xee   :  { %266 = vadd.xlane.f32.xlu1 %v265_v37  ;;  %269 = vadd.xlane.f32.xlu0 %v268_v60 }
  0xf2   :  { %272 = vadd.xlane.f32.xlu1 %v271_v61 }
 0x115   :  { %v437_v44 = vpop.f32.mrb[0].mxu0 }
 0x116   :  { %v438_v57 = vadd.f32 %v776_v42, %v437_v44  ;;  %v800_v62 = vpop.f32.mrb[1].mxu0 }
 0x118   :  { %v525_v21 = vrot.slane %v438_v57, %v524_v43  ;;  %v560_v63 = vrot.slane %v438_v57, %v559_v46 }
 0x11a   :  { %531 = vbcast.lane.b32.xlu1 %v525_v21, 264  ;;  %527 = vbcast.lane.b32.xlu0 %v525_v21, 256 }
 0x11c   :  { %v518_v22 = vpop.f32.mrb[0].mxu1 }
 0x11d   :  { %v811_v47 = vpop.f32.mrb[1].mxu1  ;;  %v519_v49 = vadd.f32 %v778_v48, %v518_v22 }
 0x11e   :  { %535 = vbcast.lane.b32.xlu1 %v525_v21, 272  ;;  %543 = vbcast.lane.b32.xlu0 %v525_v21, 288 }
 0x11f   :  { %v627_v2 = vrot.slane %v519_v49, %v524_v43  ;;  %v662_v18 = vrot.slane %v519_v49, %v559_v46 }
 0x122   :  { %539 = vbcast.lane.b32.xlu1 %v525_v21, 280  ;;  %551 = vbcast.lane.b32.xlu0 %v525_v21, 304 }
 0x126   :  { %547 = vbcast.lane.b32.xlu1 %v525_v21, 296  ;;  %562 = vbcast.lane.b32.xlu0 %v560_v63, 256 }
 0x12a   :  { %555 = vbcast.lane.b32.xlu1 %v525_v21, 312  ;;  %570 = vbcast.lane.b32.xlu0 %v560_v63, 272 }
 0x12e   :  { %566 = vbcast.lane.b32.xlu1 %v560_v63, 264  ;;  %578 = vbcast.lane.b32.xlu0 %v560_v63, 288 }
 0x132   :  { %574 = vbcast.lane.b32.xlu1 %v560_v63, 280  ;;  %586 = vbcast.lane.b32.xlu0 %v560_v63, 304 }
 0x136   :  { %582 = vbcast.lane.b32.xlu1 %v560_v63, 296  ;;  %629 = vbcast.lane.b32.xlu0 %v627_v2, 256 }
 0x13a   :  { %590 = vbcast.lane.b32.xlu1 %v560_v63, 312  ;;  %637 = vbcast.lane.b32.xlu0 %v627_v2, 272 }
 0x13e   :  { %633 = vbcast.lane.b32.xlu1 %v627_v2, 264  ;;  %645 = vbcast.lane.b32.xlu0 %v627_v2, 288 }
 0x142   :  { %641 = vbcast.lane.b32.xlu1 %v627_v2, 280  ;;  %653 = vbcast.lane.b32.xlu0 %v627_v2, 304 }
 0x146   :  { %649 = vbcast.lane.b32.xlu1 %v627_v2, 296  ;;  %664 = vbcast.lane.b32.xlu0 %v662_v18, 256 }
 0x14a   :  { %657 = vbcast.lane.b32.xlu1 %v627_v2, 312  ;;  %672 = vbcast.lane.b32.xlu0 %v662_v18, 272 }
 0x14e   :  { %668 = vbcast.lane.b32.xlu1 %v662_v18, 264  ;;  %680 = vbcast.lane.b32.xlu0 %v662_v18, 288 }
 0x152   :  { %676 = vbcast.lane.b32.xlu1 %v662_v18, 280  ;;  %688 = vbcast.lane.b32.xlu0 %v662_v18, 304 }
 0x156   :  { %684 = vbcast.lane.b32.xlu1 %v662_v18, 296 }
 0x15a   :  { %692 = vbcast.lane.b32.xlu1 %v662_v18, 312 }
 0x15f   :  { %v228_v20 = vpop.xlane.xlu0 %227 }
 0x160   :  { %v274_v42 = vmul.f32 0.00390625, %v228_v20 }
 0x162   :  { %v290_v57 = vadd.f32 1e-05, %v274_v42 }
 0x163   :  { %v231_v28 = vpop.xlane.xlu1 %230  ;;  %v234_v29 = vpop.xlane.xlu0 %233 }
 0x164   :  { %v276_v62 = vmul.f32 0.00390625, %v234_v29  ;;  %v275_v46 = vmul.f32 0.00390625, %v231_v28  ;;  %835 = vrsqrt.f32 %v290_v57 }
 0x166   :  { %v292_v47 = vadd.f32 1e-05, %v276_v62  ;;  %v291_v18 = vadd.f32 1e-05, %v275_v46 }
 0x167   :  { %v237_v52 = vpop.xlane.xlu1 %236  ;;  %v240_v53 = vpop.xlane.xlu0 %239 }
 0x168   :  { %v278_v63 = vmul.f32 0.00390625, %v240_v53  ;;  %v277_v2 = vmul.f32 0.00390625, %v237_v52  ;;  %837 = vrsqrt.f32 %v292_v47 }
 0x169   :  { %839 = vrsqrt.f32 %v291_v18 }
 0x16a   :  { %v294_v36 = vadd.f32 1e-05, %v278_v63  ;;  %v293_v42 = vadd.f32 1e-05, %v277_v2 }
 0x16b   :  { %v243_v4 = vpop.xlane.xlu1 %242  ;;  %v246_v54 = vpop.xlane.xlu0 %245 }
 0x16c   :  { %v280_v20 = vmul.f32 0.00390625, %v246_v54  ;;  %v279_v16 = vmul.f32 0.00390625, %v243_v4  ;;  %841 = vrsqrt.f32 %v294_v36 }
 0x16d   :  { %843 = vrsqrt.f32 %v293_v42 }
 0x16e   :  { %v296_v28 = vadd.f32 1e-05, %v280_v20  ;;  %v295_v52 = vadd.f32 1e-05, %v279_v16  ;;  %v836_v54 = vpop.eup %835 }
 0x16f   :  { %v249_v55 = vpop.xlane.xlu1 %248  ;;  %v252_v26 = vpop.xlane.xlu0 %251  ;;  %v322_v36 = vmul.f32 %v836_v54, %v1154_v5 }
 0x170   :  { %v282_v57 = vmul.f32 0.00390625, %v252_v26  ;;  %v281_v53 = vmul.f32 0.00390625, %v249_v55  ;;  %845 = vrsqrt.f32 %v296_v28  ;;  %v323_v55 = vmul.f32 %v836_v54, %v1157_v7 }
 0x171   :  { %847 = vrsqrt.f32 %v295_v52 }
 0x172   :  { %v298_v46 = vadd.f32 1e-05, %v282_v57  ;;  %v297_v63 = vadd.f32 1e-05, %v281_v53  ;;  %v838_v26 = vpop.eup %837 }
 0x173   :  { %v255_v37 = vpop.xlane.xlu1 %254  ;;  %v258_v12 = vpop.xlane.xlu0 %257  ;;  %v326_v53 = vmul.f32 %v838_v26, %v1160_v8  ;;  %v327_v52 = vmul.f32 %v838_v26, %v1163_v9 }
 0x174   :  { %v284_v47 = vmul.f32 0.00390625, %v258_v12  ;;  %v283_v31 = vmul.f32 0.00390625, %v255_v37  ;;  %849 = vrsqrt.f32 %v298_v46  ;;  %v840_v57 = vpop.eup %839 }
 0x175   :  { %851 = vrsqrt.f32 %v297_v63  ;;  %v324_v8 = vmul.f32 %v840_v57, %v1174_v23  ;;  %v325_v9 = vmul.f32 %v840_v57, %v1177_v11 }
 0x176   :  { %v300_v18 = vadd.f32 1e-05, %v284_v47  ;;  %v299_v42 = vadd.f32 1e-05, %v283_v31  ;;  %v842_v7 = vpop.eup %841 }
 0x177   :  { %v261_v58 = vpop.xlane.xlu1 %260  ;;  %v264_v59 = vpop.xlane.xlu0 %263 }
 0x178   :  { %v286_v2 = vmul.f32 0.00390625, %v264_v59  ;;  %v285_v12 = vmul.f32 0.00390625, %v261_v58  ;;  %v844_v46 = vpop.eup %843  ;;  %853 = vrsqrt.f32 %v300_v18 }
 0x179   :  { %855 = vrsqrt.f32 %v299_v42  ;;  %v328_v18 = vmul.f32 %v844_v46, %v1180_v27 }
 0x17a   :  { %v302_v54 = vadd.f32 1e-05, %v286_v2  ;;  %v301_v58 = vadd.f32 1e-05, %v285_v12 }
 0x17b   :  { %v1319_v39 = vpop.xlane.xlu1 %266  ;;  %v1321_v60 = vpop.xlane.xlu0 %269 }
 0x17c   :  { %v288_v59 = vmul.f32 0.00390625, %v1321_v60  ;;  %v330_v60 = vmul.f32 %v842_v7, %v1194_v19  ;;  %857 = vrsqrt.f32 %v302_v54  ;;  %v329_v19 = vmul.f32 %v844_v46, %v1183_v32 }
 0x17d   :  { %859 = vrsqrt.f32 %v301_v58 }
 0x17f   :  { %v1323_v61 = vpop.xlane.xlu1 %272 }
 0x18c   :  { %v1325_v40 = vpop.permute.xlu1 %531  ;;  %v528_v15 = vpop.permute.xlu0 %527 }
 0x18d   :  { %v592_v16 = vmul.f32 %v528_v15, %v322_v36  ;;  %v593_v20 = vmul.f32 %v528_v15, %v323_v55  ;;  %v846_v36 = vpop.eup %845  ;;  %v331_v55 = vmul.f32 %v842_v7, %v1197_v41  ;;  %v594_v23 = vmul.f32 %v1325_v40, %v324_v8 }
 0x18e   :  { %v595_v11 = vmul.f32 %v1325_v40, %v325_v9  ;;  %v334_v41 = vmul.f32 %v846_v36, %v1214_v0 }
 0x190   :  { %v1327_v43 = vpop.permute.xlu1 %535  ;;  %v1329_v44 = vpop.permute.xlu0 %543 }
 0x191   :  { %v596_v15 = vmul.f32 %v1327_v43, %v326_v53  ;;  %v597_v31 = vmul.f32 %v1327_v43, %v327_v52  ;;  %v287_v43 = vmul.f32 0.00390625, %v1319_v39  ;;  %v601_v42 = vmul.f32 %v1329_v44, %v331_v55 }
 0x192   :  { %v335_v39 = vmul.f32 %v846_v36, %v1217_v1 }
 0x193   :  { %v303_v7 = vadd.f32 1e-05, %v287_v43 }
 0x194   :  { %v1331_v21 = vpop.permute.xlu1 %539  ;;  %v1333_v22 = vpop.permute.xlu0 %551 }
 0x195   :  { %v598_v54 = vmul.f32 %v1331_v21, %v328_v18  ;;  %v599_v32 = vmul.f32 %v1331_v21, %v329_v19  ;;  %v604_v0 = vmul.f32 %v1333_v22, %v334_v41  ;;  %v605_v1 = vmul.f32 %v1333_v22, %v335_v39 }
 0x198   :  { %v1335_v48 = vpop.permute.xlu1 %547  ;;  %v1337_v49 = vpop.permute.xlu0 %562 }
 0x19c   :  { %v1339_v35 = vpop.permute.xlu1 %555  ;;  %v1341_v29 = vpop.permute.xlu0 %570 }
 0x1a0   :  { %v1343_v62 = vpop.permute.xlu1 %566  ;;  %v1345_v14 = vpop.permute.xlu0 %578 }
 0x1a4   :  { %v1347_v30 = vpop.permute.xlu1 %574  ;;  %v1349_v4 = vpop.permute.xlu0 %586 }
 0x1a5   :  { %1455 = vst [vmem:[#allocation18_spill] sm:$0xff] %v1349_v4 }
 0x1a8   :  { %v1353_v28 = vpop.permute.xlu1 %582  ;;  %v630_v37 = vpop.permute.xlu0 %629 }
 0x1a9   :  { %v694_v5 = vadd.f32 %v630_v37, %v592_v16  ;;  %v695_v4 = vadd.f32 %v630_v37, %v593_v20  ;;  %v848_v16 = vpop.eup %847  ;;  %v600_v20 = vmul.f32 %v1329_v44, %v330_v60 }
 0x1aa   :  { %v850_v37 = vpop.eup %849  ;;  %v332_v44 = vmul.f32 %v848_v16, %v1200_v45  ;;  %v333_v46 = vmul.f32 %v848_v16, %v1203_v50 }
 0x1ab   :  { %726 = vst [vmem:[#allocation8] sm:$0xff] %v694_v5  ;;  %727 = vst [vmem:[#allocation8 + $0x8] sm:$0xff] %v695_v4  ;;  %v304_v4 = vadd.f32 1e-05, %v288_v59  ;;  %v852_v5 = vpop.eup %851  ;;  %v289_v59 = vmul.f32 0.00390625, %v1323_v61  ;;  %v339_v45 = vmul.f32 %v850_v37, %v1237_v10 }
 0x1ac   :  { %v1362_v47 = vpop.permute.xlu1 %590  ;;  %v638_v63 = vpop.permute.xlu0 %637  ;;  %v336_v60 = vmul.f32 %v852_v5, %v1220_v3  ;;  %v602_v55 = vmul.f32 %v1335_v48, %v332_v44  ;;  %v603_v61 = vmul.f32 %v1335_v48, %v333_v46 }
 0x1ad   :  { %v698_v26 = vadd.f32 %v638_v63, %v596_v15  ;;  %v699_v2 = vadd.f32 %v638_v63, %v597_v31  ;;  %861 = vrsqrt.f32 %v304_v4  ;;  %v338_v15 = vmul.f32 %v850_v37, %v1234_v6  ;;  %v854_v8 = vpop.eup %853 }
 0x1ae   :  { %v856_v22 = vpop.eup %855  ;;  %863 = vrsqrt.f32 %v303_v7  ;;  %v609_v6 = vmul.f32 %v1337_v49, %v339_v45  ;;  %v342_v43 = vmul.f32 %v854_v8, %v1254_v38  ;;  %v343_v3 = vmul.f32 %v854_v8, %v1257_v17  ;;  %v1456_v7 = vld [vmem:[#allocation14_spill] sm:$0xff] }
 0x1af   :  { %730 = vst [vmem:[#allocation8 + $0x20] sm:$0xff] %v698_v26  ;;  %731 = vst [vmem:[#allocation8 + $0x28] sm:$0xff] %v699_v2  ;;  %v608_v50 = vmul.f32 %v1337_v49, %v338_v15  ;;  %v858_v10 = vpop.eup %857  ;;  %v305_v26 = vadd.f32 1e-05, %v289_v59  ;;  %v337_v2 = vmul.f32 %v852_v5, %v1223_v13  ;;  %v340_v49 = vmul.f32 %v856_v22, %v1240_v33 }
 0x1b0   :  { %v634_v12 = vpop.permute.xlu1 %633  ;;  %v646_v27 = vpop.permute.xlu0 %645  ;;  %v612_v41 = vmul.f32 %v1341_v29, %v342_v43  ;;  %v613_v13 = vmul.f32 %v1341_v29, %v343_v3  ;;  %v341_v17 = vmul.f32 %v856_v22, %v1243_v34  ;;  %v346_v39 = vmul.f32 %v858_v10, %v1274_v24  ;;  %v1462_v43 = vld [vmem:[#allocation17_spill] sm:$0xff] }
 0x1b1   :  { %v696_v57 = vadd.f32 %v634_v12, %v594_v23  ;;  %v697_v53 = vadd.f32 %v634_v12, %v595_v11  ;;  %v702_v52 = vadd.f32 %v646_v27, %v600_v20  ;;  %v703_v40 = vadd.f32 %v646_v27, %v601_v42  ;;  %v860_v20 = vpop.eup %859 }
 0x1b2   :  { %v606_v42 = vmul.f32 %v1339_v35, %v336_v60  ;;  %v607_v19 = vmul.f32 %v1339_v35, %v337_v2  ;;  %865 = vrsqrt.f32 %v305_v26  ;;  %v347_v33 = vmul.f32 %v858_v10, %v1277_v25  ;;  %v1461_v26 = vld [vmem:[#allocation16_spill] sm:$0xff] }
 0x1b3   :  { %728 = vst [vmem:[#allocation8 + $0x10] sm:$0xff] %v696_v57  ;;  %729 = vst [vmem:[#allocation8 + $0x18] sm:$0xff] %v697_v53  ;;  %v610_v29 = vmul.f32 %v1343_v62, %v340_v49  ;;  %v344_v24 = vmul.f32 %v860_v20, %v1260_v51  ;;  %v345_v25 = vmul.f32 %v860_v20, %v1263_v56  ;;  %v1459_v56 = vld [vmem:[#allocation12_spill] sm:$0xff] }
 0x1b4   :  { %734 = vst [vmem:[#allocation8 + $0x40] sm:$0xff] %v702_v52  ;;  %735 = vst [vmem:[#allocation8 + $0x48] sm:$0xff] %v703_v40  ;;  %v642_v31 = vpop.permute.xlu1 %641  ;;  %v654_v58 = vpop.permute.xlu0 %653  ;;  %v611_v52 = vmul.f32 %v1343_v62, %v341_v17  ;;  %v616_v40 = vmul.f32 %v1345_v14, %v346_v39  ;;  %v617_v5 = vmul.f32 %v1345_v14, %v347_v33 }
 0x1b5   :  { %v700_v21 = vadd.f32 %v642_v31, %v598_v54  ;;  %v701_v9 = vadd.f32 %v642_v31, %v599_v32  ;;  %v706_v63 = vadd.f32 %v654_v58, %v604_v0  ;;  %v707_v36 = vadd.f32 %v654_v58, %v605_v1  ;;  %v1457_v54 = vld [vmem:[#allocation15_spill] sm:$0xff]  ;;  %v1458_v31 = vld [vmem:[#allocation18_spill] sm:$0xff] }
 0x1b6   :  { %v614_v14 = vmul.f32 %v1347_v30, %v344_v24  ;;  %v615_v45 = vmul.f32 %v1347_v30, %v345_v25 }
 0x1b7   :  { %732 = vst [vmem:[#allocation8 + $0x30] sm:$0xff] %v700_v21  ;;  %733 = vst [vmem:[#allocation8 + $0x38] sm:$0xff] %v701_v9  ;;  %v862_v38 = vpop.eup %861  ;;  %v1460_v21 = vld [vmem:[#allocation13_spill] sm:$0xff] }
 0x1b8   :  { %738 = vst [vmem:[#allocation8 + $0x60] sm:$0xff] %v706_v63  ;;  %739 = vst [vmem:[#allocation8 + $0x68] sm:$0xff] %v707_v36  ;;  %v650_v4 = vpop.permute.xlu1 %649  ;;  %v665_v18 = vpop.permute.xlu0 %664  ;;  %v350_v44 = vmul.f32 %v862_v38, %v1456_v7  ;;  %v351_v32 = vmul.f32 %v862_v38, %v1457_v54 }
 0x1b9   :  { %v704_v16 = vadd.f32 %v650_v4, %v602_v55  ;;  %v705_v48 = vadd.f32 %v650_v4, %v603_v61  ;;  %v710_v23 = vadd.f32 %v665_v18, %v608_v50  ;;  %v711_v11 = vadd.f32 %v665_v18, %v609_v6  ;;  %v864_v34 = vpop.eup %863 }
 0x1ba   :  { %v620_v58 = vmul.f32 %v1458_v31, %v350_v44  ;;  %v621_v51 = vmul.f32 %v1458_v31, %v351_v32  ;;  %v348_v8 = vmul.f32 %v864_v34, %v1459_v56  ;;  %v349_v9 = vmul.f32 %v864_v34, %v1460_v21 }
 0x1bb   :  { %736 = vst [vmem:[#allocation8 + $0x50] sm:$0xff] %v704_v16  ;;  %737 = vst [vmem:[#allocation8 + $0x58] sm:$0xff] %v705_v48 }
 0x1bc   :  { %742 = vst [vmem:[#allocation8 + $0x80] sm:$0xff] %v710_v23  ;;  %743 = vst [vmem:[#allocation8 + $0x88] sm:$0xff] %v711_v11  ;;  %v658_v12 = vpop.permute.xlu1 %657  ;;  %v673_v27 = vpop.permute.xlu0 %672  ;;  %v618_v30 = vmul.f32 %v1353_v28, %v348_v8  ;;  %v619_v6 = vmul.f32 %v1353_v28, %v349_v9 }
 0x1bd   :  { %v708_v37 = vadd.f32 %v658_v12, %v606_v42  ;;  %v709_v35 = vadd.f32 %v658_v12, %v607_v19  ;;  %v714_v57 = vadd.f32 %v673_v27, %v612_v41  ;;  %v715_v53 = vadd.f32 %v673_v27, %v613_v13  ;;  %v866_v50 = vpop.eup %865 }
 0x1be   :  { %v352_v2 = vmul.f32 %v866_v50, %v1461_v26  ;;  %v353_v3 = vmul.f32 %v866_v50, %v1462_v43 }
 0x1bf   :  { %740 = vst [vmem:[#allocation8 + $0x70] sm:$0xff] %v708_v37  ;;  %741 = vst [vmem:[#allocation8 + $0x78] sm:$0xff] %v709_v35 }
 0x1c0   :  { %746 = vst [vmem:[#allocation8 + $0xa0] sm:$0xff] %v714_v57  ;;  %747 = vst [vmem:[#allocation8 + $0xa8] sm:$0xff] %v715_v53  ;;  %v669_v0 = vpop.permute.xlu1 %668  ;;  %v681_v1 = vpop.permute.xlu0 %680  ;;  %v622_v16 = vmul.f32 %v1362_v47, %v352_v2  ;;  %v623_v48 = vmul.f32 %v1362_v47, %v353_v3 }
 0x1c1   :  { %v712_v62 = vadd.f32 %v669_v0, %v610_v29  ;;  %v713_v59 = vadd.f32 %v669_v0, %v611_v52  ;;  %v718_v46 = vadd.f32 %v681_v1, %v616_v40  ;;  %v719_v15 = vadd.f32 %v681_v1, %v617_v5 }
 0x1c3   :  { %744 = vst [vmem:[#allocation8 + $0x90] sm:$0xff] %v712_v62  ;;  %745 = vst [vmem:[#allocation8 + $0x98] sm:$0xff] %v713_v59 }
 0x1c4   :  { %750 = vst [vmem:[#allocation8 + $0xc0] sm:$0xff] %v718_v46  ;;  %751 = vst [vmem:[#allocation8 + $0xc8] sm:$0xff] %v719_v15  ;;  %v677_v63 = vpop.permute.xlu1 %676  ;;  %v689_v36 = vpop.permute.xlu0 %688 }
 0x1c5   :  { %v716_v22 = vadd.f32 %v677_v63, %v614_v14  ;;  %v717_v60 = vadd.f32 %v677_v63, %v615_v45  ;;  %v722_v55 = vadd.f32 %v689_v36, %v620_v58  ;;  %v723_v61 = vadd.f32 %v689_v36, %v621_v51 }
 0x1c7   :  { %748 = vst [vmem:[#allocation8 + $0xb0] sm:$0xff] %v716_v22  ;;  %749 = vst [vmem:[#allocation8 + $0xb8] sm:$0xff] %v717_v60 }
 0x1c8   :  { %754 = vst [vmem:[#allocation8 + $0xe0] sm:$0xff] %v722_v55  ;;  %755 = vst [vmem:[#allocation8 + $0xe8] sm:$0xff] %v723_v61  ;;  %v685_v10 = vpop.permute.xlu1 %684 }
 0x1c9   :  { %v720_v4 = vadd.f32 %v685_v10, %v618_v30  ;;  %v721_v18 = vadd.f32 %v685_v10, %v619_v6 }
 0x1cb   :  { %752 = vst [vmem:[#allocation8 + $0xd0] sm:$0xff] %v720_v4  ;;  %753 = vst [vmem:[#allocation8 + $0xd8] sm:$0xff] %v721_v18 }
 0x1cc   :  { %v693_v28 = vpop.permute.xlu1 %692 }
 0x1cd   :  { %v724_v23 = vadd.f32 %v693_v28, %v622_v16  ;;  %v725_v11 = vadd.f32 %v693_v28, %v623_v48 }
 0x1cf   :  { %756 = vst [vmem:[#allocation8 + $0xf0] sm:$0xff] %v724_v23  ;;  %757 = vst [vmem:[#allocation8 + $0xf8] sm:$0xff] %v725_v11 }
 0x1d0   :  { %944 = shalt.err (!%p941_p0)
}
 0x1d1   :  { %s945_s18 = scalar_lea.hbm %s1441_s6, 4096 }
 0x1d2   :  { %p946_p1 = scmp.ne.s32.totalorder %s1441_s6, %s945_s18  ;;  %p949_p2 = scmp.lt.u32.totalorder %s945_s18, %s1441_s6 }
 0x1d4   :  { %p951_p3 = pnand %p949_p2, %p946_p1 }
 0x1d6   :  { %954 = shalt.err (!%p951_p3)
}
 0x1d7   :  { %769 = dma.vmem_to_hbm [thread:$0]  %s764_s14, 4096, %s1441_s6, [#allocation4], %s965_s2, %s965_s2, %s966_s21  }
 0x1d8   :  { %959 = dma.done.wait [#allocation4], 4096  }
 0x1d9   :  { %960 = vsyncadd [#allocation4], 4294963200 }
 0x1da   :  { %773 = vsyncpa [#allocation3], 1 }
 0x1db   :  { %774 = vsyncpa [#allocation6], 1 }
 0x1dc   :  { %775 = vsyncpa [#allocation4], 1 }

</bundles_post_ra>
